<compile_context>
chip_gen: v7x
topology: tpu7x:2x2x1
jax: 0.10.0
libtpu: 0.0.40
codegen_flags: <defaults>
</compile_context>

<pallas_src>
import jax
import jax.numpy as jnp
from jax.experimental import pallas as pl
from jax.experimental.pallas import tpu as pltpu


def _mlp_kernel(x_ref, t_ref,
                w1_ref, b1_ref,
                w2_ref, b2_ref,
                w3_ref, b3_ref,
                w4t_ref, b4_ref,
                out_ref):
    # Fused 4-layer MLP: (3->128) ReLU (128->256) ReLU (256->384pad) ReLU (384pad->2)
    x = x_ref[...].astype(jnp.float32)                    # [tm, 2]
    t = t_ref[...].astype(jnp.float32) / 1000.0           # [tm, 1]  (exact /1000 as in ref)

    # ---- Layer 1: pure VPU (three rank-1 broadcast outer products + bias) ----
    w1 = w1_ref[...].astype(jnp.float32)                  # [3, 128]
    h1 = (x[:, 0:1] * w1[0:1, :]
          + x[:, 1:2] * w1[1:2, :]
          + t * w1[2:3, :]
          + b1_ref[...])
    h1 = jnp.maximum(h1, 0.0)                              # [tm, 128] f32

    # ---- Layers 2 & 3: MXU, bf16 (or f32) operands, f32 accumulation ----
    mxu_dtype = w2_ref.dtype                               # bf16 or f32 (set in wrapper)
    h2 = jnp.dot(h1.astype(mxu_dtype), w2_ref[...],
                 preferred_element_type=jnp.float32) + b2_ref[...]
    h2 = jnp.maximum(h2, 0.0)                              # [tm, 256] f32

    h3 = jnp.dot(h2.astype(mxu_dtype), w3_ref[...],
                 preferred_element_type=jnp.float32) + b3_ref[...]
    h3 = jnp.maximum(h3, 0.0)                              # [tm, 384] f32 (cols 320: exact 0)

    # ---- Layer 4: off the MXU — VPU multiplies + lane (XLU) reductions ----
    w4t = w4t_ref[...]                                     # [2, 384] f32
    s0 = jnp.sum(h3 * w4t[0:1, :], axis=-1, keepdims=True)  # [tm, 1]
    s1 = jnp.sum(h3 * w4t[1:2, :], axis=-1, keepdims=True)  # [tm, 1]
    out_ref[:, 0:1] = (s0 + b4_ref[:, 0:1]).astype(out_ref.dtype)
    out_ref[:, 1:2] = (s1 + b4_ref[:, 1:2]).astype(out_ref.dtype)


def _choose_tm(n, cap=2048):
    """Batch tile: as large as sensible (VMEM-budgeted, portable to v7x's 64 MiB),
    with an even-ish >=2-way split once the batch is big enough so that
    dimension_semantics=("parallel",) can shard the grid across v7x's 2 TCs."""
    if n <= cap:
        if n >= 1024:
            half = (n + 1) // 2
            return min(cap, ((half + 255) // 256) * 256)   # two ~equal tiles, mult. of 256
        return n   # single tile (block == full array, always layout-legal)
    return cap


def denoise_mlp_forward(x, t, params, *, tm=None, use_bf16_matmul=True):
    """x: [N, 2] (any float dtype), t: [N] (any numeric dtype). Returns [N, 2] float32.

    use_bf16_matmul: feed the MXU bf16 operands (f32 accumulation). ~2-4x faster on
    the matmul-bound portion but no longer bit-matching the f32 reference.
    """
    n = x.shape[0]
    (w1, b1), (w2, b2), (w3, b3), (w4, b4) = params

    # Zero-pad the 320 hidden dim up to a multiple of 128 (-> 384): dense lane tiles,
    # bitwise-identical results (padded activations are exact zeros).
    pad = (-w3.shape[1]) % 128
    if pad:
        w3p = jnp.pad(w3, ((0, 0), (0, pad)))
        b3p = jnp.pad(b3, ((0, 0), (0, pad)))
        w4p = jnp.pad(w4, ((0, pad), (0, 0)))
    else:
        w3p, b3p, w4p = w3, b3, w4
    w4t = jnp.transpose(w4p)                 # [2, 384] — layer 4 runs on the VPU, keep f32

    mxu_dtype = jnp.bfloat16 if use_bf16_matmul else jnp.float32
    w2m = w2.astype(mxu_dtype)               # [128, 256]
    w3m = w3p.astype(mxu_dtype)              # [256, 384]

    t_col = t.reshape(n, 1)                  # original dtype; cast + /1000 fused in-kernel

    if tm is None:
        tm = _choose_tm(n)
    tm = max(1, min(int(tm), n))
    if tm != n and tm % 8 != 0:
        tm = min(n, ((tm + 7) // 8) * 8)     # enforce the (8,128) sublane constraint
    grid = (pl.cdiv(n, tm),)

    d_in = x.shape[1]
    d_out = w4.shape[1]

    # Weights/biases: whole array resident in VMEM for the kernel's lifetime
    # (no per-step pipelining / double-buffering of constant blocks).
    vmem_full = pl.BlockSpec(memory_space=pltpu.MemorySpace.VMEM)

    out = pl.pallas_call(
        _mlp_kernel,
        out_shape=jax.ShapeDtypeStruct((n, d_out), jnp.float32),
        grid_spec=pltpu.PrefetchScalarGridSpec(
            num_scalar_prefetch=0,
            grid=grid,
            in_specs=[
                pl.BlockSpec((tm, d_in), lambda i: (i, 0)),   # x tile
                pl.BlockSpec((tm, 1), lambda i: (i, 0)),      # t tile
                vmem_full, vmem_full,                         # w1, b1
                vmem_full, vmem_full,                         # w2, b2
                vmem_full, vmem_full,                         # w3, b3
                vmem_full, vmem_full,                         # w4^T, b4
            ],
            out_specs=pl.BlockSpec((tm, d_out), lambda i: (i, 0)),
        ),
        compiler_params=pltpu.CompilerParams(
            dimension_semantics=("parallel",),
            # 32 MiB scoped VMEM: enough for tm=2048 (+ resident weights, double-
            # buffered I/O tiles) and safe on v7x's 64 MiB physical VMEM per TC.
            vmem_limit_bytes=32 * 1024 * 1024,
        ),
    )(x, t_col, w1, b1, w2m, b2, w3m, b3p, w4t, b4)
    return out


def init_params(key):
    """Deterministic init mimicking nn.Linear default (U(-1/sqrt(fan_in), 1/sqrt(fan_in))).
    Weights stored transposed relative to PyTorch: shape [in, out] for x @ W."""
    dims = [(3, 128), (128, 256), (256, 320), (320, 2)]
    params = []
    for (fan_in, fan_out) in dims:
        key, kw, kb = jax.random.split(key, 3)
        bound = 1.0 / jnp.sqrt(jnp.float32(fan_in))
        w = jax.random.uniform(kw, (fan_in, fan_out), jnp.float32, -bound, bound)
        b = jax.random.uniform(kb, (1, fan_out), jnp.float32, -bound, bound)
        params.append((w, b))
    return params


def reference_forward(x, t, params):
    t_col = t.reshape(-1, 1).astype(jnp.float32) / 1000.0
    h = jnp.concatenate([x.astype(jnp.float32), t_col], axis=1)
    (w1, b1), (w2, b2), (w3, b3), (w4, b4) = params
    h = jnp.maximum(h @ w1 + b1, 0.0)
    h = jnp.maximum(h @ w2 + b2, 0.0)
    h = jnp.maximum(h @ w3 + b3, 0.0)
    return h @ w4 + b4


if __name__ == "__main__":
    key = jax.random.PRNGKey(0)
    kx, kt, kp = jax.random.split(key, 3)

    params = init_params(kp)

    # 1) Exact f32 path (single tile) — must match the f32 reference tightly.
    N = 64
    x = jax.random.normal(kx, (N, 2), jnp.float32)
    t = jax.random.randint(kt, (N,), 0, 1000, jnp.int32)
    out = jax.block_until_ready(denoise_mlp_forward(x, t, params, use_bf16_matmul=False))
    ref = reference_forward(x, t, params)
    assert out.shape == (N, 2), out.shape
    assert jnp.allclose(out, ref, atol=1e-5, rtol=1e-5), float(jnp.max(jnp.abs(out - ref)))

    # 2) Default bf16-MXU path, multi-tile grid with a partial last tile.
    N2 = 300
    x2 = jax.random.normal(kx, (N2, 2), jnp.float32)
    t2 = jax.random.randint(kt, (N2,), 0, 1000, jnp.int32)
    out2 = jax.block_until_ready(denoise_mlp_forward(x2, t2, params, tm=128))
    ref2 = reference_forward(x2, t2, params)
    assert out2.shape == (N2, 2), out2.shape
    assert jnp.allclose(out2, ref2, atol=2e-2, rtol=2e-2), float(jnp.max(jnp.abs(out2 - ref2)))

    print("KERNEL_OK")
</pallas_src>

<mosaic_0001>
module attributes {stable_mosaic.version = 11 : i64} {
  func.func @_mlp_kernel(%arg0: i32, %arg1: memref<64x2xf32, #tpu.memory_space<vmem>>, %arg2: memref<64x1xi32, #tpu.memory_space<vmem>>, %arg3: memref<3x128xf32, #tpu.memory_space<vmem>>, %arg4: memref<1x128xf32, #tpu.memory_space<vmem>>, %arg5: memref<128x256xf32, #tpu.memory_space<vmem>>, %arg6: memref<1x256xf32, #tpu.memory_space<vmem>>, %arg7: memref<256x384xf32, #tpu.memory_space<vmem>>, %arg8: memref<1x384xf32, #tpu.memory_space<vmem>>, %arg9: memref<2x384xf32, #tpu.memory_space<vmem>>, %arg10: memref<1x2xf32, #tpu.memory_space<vmem>>, %arg11: memref<64x2xf32, #tpu.memory_space<vmem>>) attributes {dimension_semantics = [#tpu.dimension_semantics<parallel>], iteration_bounds = array<i64: 1>, scalar_prefetch = 0 : i64, scratch_operands = 0 : i64, tpu.core_type = #tpu.core_type<tc>, window_params = [{transform_indices = @transform_0, window_bounds = array<i64: 64, 2>}, {transform_indices = @transform_1, window_bounds = array<i64: 64, 1>}, {pipeline_mode = #tpu.pipeline_mode<synchronous>, transform_indices = @transform_2, window_bounds = array<i64: 3, 128>}, {pipeline_mode = #tpu.pipeline_mode<synchronous>, transform_indices = @transform_3, window_bounds = array<i64: 1, 128>}, {pipeline_mode = #tpu.pipeline_mode<synchronous>, transform_indices = @transform_4, window_bounds = array<i64: 128, 256>}, {pipeline_mode = #tpu.pipeline_mode<synchronous>, transform_indices = @transform_5, window_bounds = array<i64: 1, 256>}, {pipeline_mode = #tpu.pipeline_mode<synchronous>, transform_indices = @transform_6, window_bounds = array<i64: 256, 384>}, {pipeline_mode = #tpu.pipeline_mode<synchronous>, transform_indices = @transform_7, window_bounds = array<i64: 1, 384>}, {pipeline_mode = #tpu.pipeline_mode<synchronous>, transform_indices = @transform_8, window_bounds = array<i64: 2, 384>}, {pipeline_mode = #tpu.pipeline_mode<synchronous>, transform_indices = @transform_9, window_bounds = array<i64: 1, 2>}, {transform_indices = @transform_10, window_bounds = array<i64: 64, 2>}]} {
    %c0 = arith.constant 0 : index
    %c0_0 = arith.constant 0 : index
    %0 = vector.load %arg1[%c0, %c0_0] : memref<64x2xf32, #tpu.memory_space<vmem>>, vector<64x2xf32>
    %c0_1 = arith.constant 0 : index
    %c0_2 = arith.constant 0 : index
    %1 = vector.load %arg2[%c0_1, %c0_2] : memref<64x1xi32, #tpu.memory_space<vmem>>, vector<64x1xi32>
    %2 = arith.sitofp %1 : vector<64x1xi32> to vector<64x1xf32>
    %cst = arith.constant 1.000000e+03 : f32
    %3 = vector.broadcast %cst : f32 to vector<64x1xf32>
    %4 = arith.divf %2, %3 : vector<64x1xf32>
    %c0_3 = arith.constant 0 : index
    %c0_4 = arith.constant 0 : index
    %5 = vector.load %arg3[%c0_3, %c0_4] : memref<3x128xf32, #tpu.memory_space<vmem>>, vector<3x128xf32>
    %6 = vector.extract_strided_slice %0 {offsets = [0, 0], sizes = [64, 1], strides = [1, 1]} : vector<64x2xf32> to vector<64x1xf32>
    %7 = vector.extract_strided_slice %5 {offsets = [0, 0], sizes = [1, 128], strides = [1, 1]} : vector<3x128xf32> to vector<1x128xf32>
    %8 = vector.broadcast %6 : vector<64x1xf32> to vector<64x128xf32>
    %9 = vector.broadcast %7 : vector<1x128xf32> to vector<64x128xf32>
    %10 = arith.mulf %8, %9 : vector<64x128xf32>
    %11 = vector.extract_strided_slice %0 {offsets = [0, 1], sizes = [64, 1], strides = [1, 1]} : vector<64x2xf32> to vector<64x1xf32>
    %12 = vector.extract_strided_slice %5 {offsets = [1, 0], sizes = [1, 128], strides = [1, 1]} : vector<3x128xf32> to vector<1x128xf32>
    %13 = vector.broadcast %11 : vector<64x1xf32> to vector<64x128xf32>
    %14 = vector.broadcast %12 : vector<1x128xf32> to vector<64x128xf32>
    %15 = arith.mulf %13, %14 : vector<64x128xf32>
    %16 = arith.addf %10, %15 : vector<64x128xf32>
    %17 = vector.extract_strided_slice %5 {offsets = [2, 0], sizes = [1, 128], strides = [1, 1]} : vector<3x128xf32> to vector<1x128xf32>
    %18 = vector.broadcast %4 : vector<64x1xf32> to vector<64x128xf32>
    %19 = vector.broadcast %17 : vector<1x128xf32> to vector<64x128xf32>
    %20 = arith.mulf %18, %19 : vector<64x128xf32>
    %21 = arith.addf %16, %20 : vector<64x128xf32>
    %c0_5 = arith.constant 0 : index
    %c0_6 = arith.constant 0 : index
    %22 = vector.load %arg4[%c0_5, %c0_6] : memref<1x128xf32, #tpu.memory_space<vmem>>, vector<1x128xf32>
    %23 = vector.broadcast %22 : vector<1x128xf32> to vector<64x128xf32>
    %24 = arith.addf %21, %23 : vector<64x128xf32>
    %cst_7 = arith.constant 0.000000e+00 : f32
    %25 = vector.broadcast %cst_7 : f32 to vector<64x128xf32>
    %26 = arith.maximumf %24, %25 : vector<64x128xf32>
    %c0_8 = arith.constant 0 : index
    %c0_9 = arith.constant 0 : index
    %27 = vector.load %arg5[%c0_8, %c0_9] : memref<128x256xf32, #tpu.memory_space<vmem>>, vector<128x256xf32>
    %cst_10 = arith.constant dense<0.000000e+00> : vector<64x256xf32>
    %28 = tpu.matmul %26, %27, %cst_10 {dimension_numbers = #tpu.dot_dimension_numbers<[1], [0], [0], [1], [0, 0, 1, 1], [], []>} : vector<64x128xf32>, vector<128x256xf32>, vector<64x256xf32> -> vector<64x256xf32>
    %c0_11 = arith.constant 0 : index
    %c0_12 = arith.constant 0 : index
    %29 = vector.load %arg6[%c0_11, %c0_12] : memref<1x256xf32, #tpu.memory_space<vmem>>, vector<1x256xf32>
    %30 = vector.broadcast %29 : vector<1x256xf32> to vector<64x256xf32>
    %31 = arith.addf %28, %30 : vector<64x256xf32>
    %cst_13 = arith.constant 0.000000e+00 : f32
    %32 = vector.broadcast %cst_13 : f32 to vector<64x256xf32>
    %33 = arith.maximumf %31, %32 : vector<64x256xf32>
    %c0_14 = arith.constant 0 : index
    %c0_15 = arith.constant 0 : index
    %34 = vector.load %arg7[%c0_14, %c0_15] : memref<256x384xf32, #tpu.memory_space<vmem>>, vector<256x384xf32>
    %cst_16 = arith.constant dense<0.000000e+00> : vector<64x384xf32>
    %35 = tpu.matmul %33, %34, %cst_16 {dimension_numbers = #tpu.dot_dimension_numbers<[1], [0], [0], [1], [0, 0, 1, 1], [], []>} : vector<64x256xf32>, vector<256x384xf32>, vector<64x384xf32> -> vector<64x384xf32>
    %c0_17 = arith.constant 0 : index
    %c0_18 = arith.constant 0 : index
    %36 = vector.load %arg8[%c0_17, %c0_18] : memref<1x384xf32, #tpu.memory_space<vmem>>, vector<1x384xf32>
    %37 = vector.broadcast %36 : vector<1x384xf32> to vector<64x384xf32>
    %38 = arith.addf %35, %37 : vector<64x384xf32>
    %cst_19 = arith.constant 0.000000e+00 : f32
    %39 = vector.broadcast %cst_19 : f32 to vector<64x384xf32>
    %40 = arith.maximumf %38, %39 : vector<64x384xf32>
    %c0_20 = arith.constant 0 : index
    %c0_21 = arith.constant 0 : index
    %41 = vector.load %arg9[%c0_20, %c0_21] : memref<2x384xf32, #tpu.memory_space<vmem>>, vector<2x384xf32>
    %42 = vector.extract_strided_slice %41 {offsets = [0, 0], sizes = [1, 384], strides = [1, 1]} : vector<2x384xf32> to vector<1x384xf32>
    %43 = vector.broadcast %42 : vector<1x384xf32> to vector<64x384xf32>
    %44 = arith.mulf %40, %43 : vector<64x384xf32>
    %cst_22 = arith.constant dense<0.000000e+00> : vector<64xf32>
    %45 = vector.multi_reduction <add>, %44, %cst_22 [1] : vector<64x384xf32> to vector<64xf32>
    %46 = vector.shape_cast %45 : vector<64xf32> to vector<64x1xf32>
    %47 = vector.extract_strided_slice %41 {offsets = [1, 0], sizes = [1, 384], strides = [1, 1]} : vector<2x384xf32> to vector<1x384xf32>
    %48 = vector.broadcast %47 : vector<1x384xf32> to vector<64x384xf32>
    %49 = arith.mulf %40, %48 : vector<64x384xf32>
    %cst_23 = arith.constant dense<0.000000e+00> : vector<64xf32>
    %50 = vector.multi_reduction <add>, %49, %cst_23 [1] : vector<64x384xf32> to vector<64xf32>
    %51 = vector.shape_cast %50 : vector<64xf32> to vector<64x1xf32>
    %c0_24 = arith.constant 0 : index
    %c0_25 = arith.constant 0 : index
    %52 = vector.load %arg10[%c0_24, %c0_25] : memref<1x2xf32, #tpu.memory_space<vmem>>, vector<1x1xf32>
    %53 = vector.broadcast %52 : vector<1x1xf32> to vector<64x1xf32>
    %54 = arith.addf %46, %53 : vector<64x1xf32>
    %c0_26 = arith.constant 0 : index
    %c0_27 = arith.constant 0 : index
    %55 = vector.load %arg11[%c0_26, %c0_27] : memref<64x2xf32, #tpu.memory_space<vmem>>, vector<64x1xf32>
    tpu.vector_store %arg11[%c0_26, %c0_27], %54 {strides = array<i32>} : memref<64x2xf32, #tpu.memory_space<vmem>>, vector<64x1xf32>,
    %c0_28 = arith.constant 0 : index
    %c1 = arith.constant 1 : index
    %56 = vector.load %arg10[%c0_28, %c1] : memref<1x2xf32, #tpu.memory_space<vmem>>, vector<1x1xf32>
    %57 = vector.broadcast %56 : vector<1x1xf32> to vector<64x1xf32>
    %58 = arith.addf %51, %57 : vector<64x1xf32>
    %c0_29 = arith.constant 0 : index
    %c1_30 = arith.constant 1 : index
    %59 = vector.load %arg11[%c0_29, %c1_30] : memref<64x2xf32, #tpu.memory_space<vmem>>, vector<64x1xf32>
    tpu.vector_store %arg11[%c0_29, %c1_30], %58 {strides = array<i32>} : memref<64x2xf32, #tpu.memory_space<vmem>>, vector<64x1xf32>,
    return
  }
  func.func @transform_0(%arg0: i32) -> (i32, i32) {
    %c0_i32 = arith.constant 0 : i32
    %c0_i32_0 = arith.constant 0 : i32
    return %arg0, %c0_i32 : i32, i32
  }
  func.func @transform_1(%arg0: i32) -> (i32, i32) {
    %c0_i32 = arith.constant 0 : i32
    %c0_i32_0 = arith.constant 0 : i32
    return %arg0, %c0_i32 : i32, i32
  }
  func.func @transform_2(%arg0: i32) -> (i32, i32) {
    %c0_i32 = arith.constant 0 : i32
    %c0_i32_0 = arith.constant 0 : i32
    %c0_i32_1 = arith.constant 0 : i32
    return %c0_i32, %c0_i32_0 : i32, i32
  }
  func.func @transform_3(%arg0: i32) -> (i32, i32) {
    %c0_i32 = arith.constant 0 : i32
    %c0_i32_0 = arith.constant 0 : i32
    %c0_i32_1 = arith.constant 0 : i32
    return %c0_i32, %c0_i32_0 : i32, i32
  }
  func.func @transform_4(%arg0: i32) -> (i32, i32) {
    %c0_i32 = arith.constant 0 : i32
    %c0_i32_0 = arith.constant 0 : i32
    %c0_i32_1 = arith.constant 0 : i32
    return %c0_i32, %c0_i32_0 : i32, i32
  }
  func.func @transform_5(%arg0: i32) -> (i32, i32) {
    %c0_i32 = arith.constant 0 : i32
    %c0_i32_0 = arith.constant 0 : i32
    %c0_i32_1 = arith.constant 0 : i32
    return %c0_i32, %c0_i32_0 : i32, i32
  }
  func.func @transform_6(%arg0: i32) -> (i32, i32) {
    %c0_i32 = arith.constant 0 : i32
    %c0_i32_0 = arith.constant 0 : i32
    %c0_i32_1 = arith.constant 0 : i32
    return %c0_i32, %c0_i32_0 : i32, i32
  }
  func.func @transform_7(%arg0: i32) -> (i32, i32) {
    %c0_i32 = arith.constant 0 : i32
    %c0_i32_0 = arith.constant 0 : i32
    %c0_i32_1 = arith.constant 0 : i32
    return %c0_i32, %c0_i32_0 : i32, i32
  }
  func.func @transform_8(%arg0: i32) -> (i32, i32) {
    %c0_i32 = arith.constant 0 : i32
    %c0_i32_0 = arith.constant 0 : i32
    %c0_i32_1 = arith.constant 0 : i32
    return %c0_i32, %c0_i32_0 : i32, i32
  }
  func.func @transform_9(%arg0: i32) -> (i32, i32) {
    %c0_i32 = arith.constant 0 : i32
    %c0_i32_0 = arith.constant 0 : i32
    %c0_i32_1 = arith.constant 0 : i32
    return %c0_i32, %c0_i32_0 : i32, i32
  }
  func.func @transform_10(%arg0: i32) -> (i32, i32) {
    %c0_i32 = arith.constant 0 : i32
    %c0_i32_0 = arith.constant 0 : i32
    return %arg0, %c0_i32 : i32, i32
  }
}

</mosaic_0001>

<bundles_post_ra>
// kernel: tpu_custom_call.1
= control target key start
LH: loop header
LB: loop body
LE: loop exit
PB: predicated region body
PF: predicated region fallthrough
CT: control target
= control target key end

     0   :  { %15 = vsyncpa [#allocation3], 0  ;;  %s1722_s0 = inlined_call_operand.vmem [shape: f32[64,2], index: 0, kind: input, shape index: {}]   ;;  %s1723_s1 = inlined_call_operand.vmem [shape: s32[64,1], index: 1, kind: input, shape index: {}]   ;;  %s1724_s2 = inlined_call_operand.vmem [shape: f32[3,128], index: 2, kind: input, shape index: {}]   ;;  %s1725_s3 = inlined_call_operand.vmem [shape: f32[1,128], index: 3, kind: input, shape index: {}]   ;;  %s1726_s4 = inlined_call_operand.hbm [shape: f32[128,256], index: 4, kind: input, shape index: {}]   ;;  %s1727_s5 = inlined_call_operand.vmem [shape: f32[1,256], index: 5, kind: input, shape index: {}]   ;;  %s1728_s6 = inlined_call_operand.hbm [shape: f32[256,384], index: 6, kind: input, shape index: {}]   ;;  %s1729_s7 = inlined_call_operand.vmem [shape: f32[1,384], index: 7, kind: input, shape index: {}]   ;;  %s1730_s8 = inlined_call_operand.vmem [shape: f32[2,384], index: 8, kind: input, shape index: {}]   ;;  %s1731_s9 = inlined_call_operand.vmem [shape: f32[1,2], index: 9, kind: input, shape index: {}]   ;;  %s1732_s10 = inlined_call_operand.vmem [shape: f32[64,2], index: 10, kind: output, shape index: {}]  }
   0x1   :  { %16 = vsyncpa [#allocation5], 0  ;;  %s1291_s13 = smov [#allocation2]   ;;  %s1243_s17 = scalar_lea.hbm %s1726_s4, 4096 }
   0x2   :  { %s30_s14 = sshll.u32 %s1291_s13, 4  ;;  %p1244_p0 = scmp.ne.s32.totalorder %s1726_s4, %s1243_s17  ;;  %s31_s14 = int_to_ptr.vmem [resolvable:$true] %s30_s14 }
   0x3   :  { %p1247_p1 = scmp.lt.u32.totalorder %s1243_s17, %s1726_s4 }
   0x5   :  { %p1249_p2 = pnand %p1247_p1, %p1244_p0 }
   0x7   :  { %1252 = shalt.err (!%p1249_p2)
}
   0x8   :  { %s1253_s22 = scalar_lea.vmem %s31_s14, 4096  ;;  %p1258_p4 = scmp.lt.s32.totalorder %s31_s14, %s31_s14 }
   0x9   :  { %p1254_p3 = scmp.ne.s32.totalorder %s31_s14, %s1253_s22  ;;  %p1259_p5 = scmp.lt.s32.totalorder %s1253_s22, %s1253_s22 }
   0xb   :  { %p1260_p6 = por %p1259_p5, %p1258_p4 }
   0xd   :  { %p1261_p7 = pnand %p1260_p6, %p1254_p3 }
   0xf   :  { %1264 = shalt.err (!%p1261_p7)
}
  0x10   :  { %s1292_s23 = smov 256   ;;  %s1293_s24 = smov 16  }
  0x11   :  { %36 = dma.hbm_to_vmem [thread:$0]  %s1726_s4, 4096, %s31_s14, [#allocation3], %s1292_s23, %s1292_s23, %s1293_s24  }
  0x12   :  { %s1294_s27 = smov [#allocation4]   ;;  %s1265_s11 = scalar_lea.hbm %s1728_s6, 12288 }
  0x13   :  { %s44_s28 = sshll.u32 %s1294_s27, 4  ;;  %p1266_p8 = scmp.ne.s32.totalorder %s1728_s6, %s1265_s11  ;;  %s45_s28 = int_to_ptr.vmem [resolvable:$true] %s44_s28 }
  0x14   :  { %p1269_p9 = scmp.lt.u32.totalorder %s1265_s11, %s1728_s6 }
  0x16   :  { %p1271_p10 = pnand %p1269_p9, %p1266_p8 }
  0x18   :  { %1274 = shalt.err (!%p1271_p10)
}
  0x19   :  { %s1275_s17 = scalar_lea.vmem %s45_s28, 12288  ;;  %p1280_p12 = scmp.lt.s32.totalorder %s45_s28, %s45_s28 }
  0x1a   :  { %p1276_p11 = scmp.ne.s32.totalorder %s45_s28, %s1275_s17  ;;  %p1281_p13 = scmp.lt.s32.totalorder %s1275_s17, %s1275_s17 }
  0x1c   :  { %p1282_p0 = por %p1281_p13, %p1280_p12 }
  0x1e   :  { %p1283_p1 = pnand %p1282_p0, %p1276_p11 }
  0x20   :  { %1286 = shalt.err (!%p1283_p1)
}
  0x21   :  { %s1295_s4 = smov 384   ;;  %s1296_s14 = smov 24  }
  0x22   :  { %50 = dma.hbm_to_vmem [thread:$0]  %s1728_s6, 12288, %s45_s28, [#allocation5], %s1295_s4, %s1295_s4, %s1296_s14  }
  0x23   :  { %1287 = dma.done.wait [#allocation3], 4096  }
  0x24   :  { %1288 = vsyncadd [#allocation3], 4294963200 }
  0x25   :  { %1289 = dma.done.wait [#allocation5], 12288  }
  0x26   :  { %1290 = vsyncadd [#allocation5], 4294955008  ;;  %v1297_v0 = vmov 1   ;;  %v1298_v1 = vmov 0   ;;  %v64_v2 = vld [vmem:[%s1722_s0 + $0x8] sm:$0xff]  ;;  %v63_v3 = vld [vmem:[%s1722_s0] sm:$0xff] }
  0x27   :  { %1230 = vset.pattern.permute.xlu0 %v1297_v0  ;;  %1231 = vset.pattern.permute.xlu1 %v1298_v1  ;;  %v1390_v4 = vld [vmem:[%s1722_s0 + $0x18] sm:$0xff]  ;;  %v71_v5 = vld [vmem:[%s1723_s1] sm:$0xff]  ;;  %v285_v7 = vld [vmem:[#allocation2 + $0x8] sm:$0xff]  ;;  %v1299_v55 = vmov 0.0   ;;  %vm995_vm0 = vcmask 7168   ;;  %vm1019_vm1 = vcmask 15368  }
  0x28   :  { %104 = vperm.xlu1 %1231, %v64_v2   ;;  %150 = vperm.xlu0 %1230, %v63_v3   ;;  %v1400_v6 = vld [vmem:[%s1722_s0 + $0x20] sm:$0xff]  ;;  %v65_v8 = vld [vmem:[%s1722_s0 + $0x10] sm:$0xff]  ;;  %v287_v9 = vld [vmem:[#allocation2 + $0x18] sm:$0xff]  ;;  %v79_v11 = vcvt.s32.f32 %v71_v5 }
  0x29   :  { %v284_v10 = vld [vmem:[#allocation2] sm:$0xff]  ;;  %v72_v12 = vld [vmem:[%s1723_s1 + $0x8] sm:$0xff]  ;;  %v1093_v13 = vpack.c.bf16 %v287_v9, %v285_v7  ;;  %v286_v14 = vld [vmem:[#allocation2 + $0x10] sm:$0xff]  ;;  %392 = vmatprep.mubr.f32.mxu0 %v1299_v55 }
  0x2a   :  { %v289_v15 = vld [vmem:[#allocation2 + $0x28] sm:$0xff]  ;;  %v1095_v16 = vpack.c.bf16 %v286_v14, %v284_v10  ;;  %v291_v17 = vld [vmem:[#allocation2 + $0x38] sm:$0xff]  ;;  %v288_v18 = vld [vmem:[#allocation2 + $0x20] sm:$0xff]  ;;  %v80_v23 = vcvt.s32.f32 %v72_v12  ;;  %v88_v25 = vmul.f32 0.001, %v79_v11 }
  0x2b   :  { %v290_v19 = vld [vmem:[#allocation2 + $0x30] sm:$0xff]  ;;  %1094 = vmatprep.subr.bf16.mxu0 %v1093_v13  ;;  %v1097_v20 = vpack.c.bf16 %v291_v17, %v289_v15  ;;  %v293_v21 = vld [vmem:[#allocation2 + $0x48] sm:$0xff]  ;;  %v295_v22 = vld [vmem:[#allocation2 + $0x58] sm:$0xff] }
  0x2c   :  { %1232 = vset.pattern.permute.xlu1 %v1297_v0  ;;  %162 = vperm.xlu0 %1230, %v1390_v4   ;;  %v1099_v24 = vpack.c.bf16 %v290_v19, %v288_v18  ;;  %v73_v26 = vld [vmem:[%s1723_s1 + $0x10] sm:$0xff]  ;;  %v1101_v27 = vpack.c.bf16 %v295_v22, %v293_v21  ;;  %v292_v28 = vld [vmem:[#allocation2 + $0x40] sm:$0xff]  ;;  %v297_v30 = vld [vmem:[#allocation2 + $0x68] sm:$0xff]  ;;  %v89_v32 = vmul.f32 0.001, %v80_v23 }
  0x2d   :  { %154 = vperm.xlu1 %1232, %v64_v2   ;;  %1096 = vmatpush1.bf16.msra.mxu0 %v1095_v16  ;;  %v294_v29 = vld [vmem:[#allocation2 + $0x50] sm:$0xff]  ;;  %v299_v31 = vld [vmem:[#allocation2 + $0x78] sm:$0xff]  ;;  %v81_v33 = vcvt.s32.f32 %v73_v26  ;;  %v296_v36 = vld [vmem:[#allocation2 + $0x60] sm:$0xff] }
  0x2e   :  { %1098 = vmatprep.subr.bf16.mxu0 %v1097_v20  ;;  %v1103_v34 = vpack.c.bf16 %v294_v29, %v292_v28  ;;  %v1105_v35 = vpack.c.bf16 %v299_v31, %v297_v30  ;;  %v298_v37 = vld [vmem:[#allocation2 + $0x70] sm:$0xff]  ;;  %v301_v38 = vld [vmem:[#allocation2 + $0x88] sm:$0xff]  ;;  %v303_v39 = vld [vmem:[#allocation2 + $0x98] sm:$0xff] }
  0x2f   :  { %v90_v40 = vmul.f32 0.001, %v81_v33  ;;  %v74_v41 = vld [vmem:[%s1723_s1 + $0x18] sm:$0xff]  ;;  %v1107_v42 = vpack.c.bf16 %v298_v37, %v296_v36  ;;  %v1109_v43 = vpack.c.bf16 %v303_v39, %v301_v38  ;;  %v300_v44 = vld [vmem:[#allocation2 + $0x80] sm:$0xff]  ;;  %v302_v45 = vld [vmem:[#allocation2 + $0x90] sm:$0xff] }
  0x30   :  { %166 = vperm.xlu0 %1230, %v1400_v6   ;;  %v305_v46 = vld [vmem:[#allocation2 + $0xa8] sm:$0xff]  ;;  %v307_v47 = vld [vmem:[#allocation2 + $0xb8] sm:$0xff]  ;;  %v82_v48 = vcvt.s32.f32 %v74_v41  ;;  %v1111_v50 = vpack.c.bf16 %v302_v45, %v300_v44  ;;  %v77_v51 = vld [vmem:[%s1723_s1 + $0x30] sm:$0xff] }
  0x31   :  { %1233 = vset.pattern.permute.xlu1 %v1298_v1  ;;  %1100 = vmatpush1.bf16.msra.mxu0 %v1099_v24  ;;  %v68_v49 = vld [vmem:[%s1722_s0 + $0x28] sm:$0xff]  ;;  %v1113_v52 = vpack.c.bf16 %v307_v47, %v305_v46  ;;  %v304_v53 = vld [vmem:[#allocation2 + $0xa0] sm:$0xff]  ;;  %v306_v54 = vld [vmem:[#allocation2 + $0xb0] sm:$0xff]  ;;  %v85_v59 = vcvt.s32.f32 %v77_v51 }
  0x32   :  { %109 = vperm.xlu1 %1233, %v65_v8   ;;  %1102 = vmatprep.subr.bf16.mxu0 %v1101_v27  ;;  %v309_v56 = vld [vmem:[#allocation2 + $0xc8] sm:$0xff]  ;;  %v311_v57 = vld [vmem:[#allocation2 + $0xd8] sm:$0xff]  ;;  %v91_v58 = vmul.f32 0.001, %v82_v48  ;;  %v75_v60 = vld [vmem:[%s1723_s1 + $0x20] sm:$0xff]  ;;  %v1115_v61 = vpack.c.bf16 %v306_v54, %v304_v53 }
  0x33   :  { %v69_v62 = vld [vmem:[%s1722_s0 + $0x30] sm:$0xff]  ;;  %v1117_v63 = vpack.c.bf16 %v311_v57, %v309_v56  ;;  %v308_v2 = vld [vmem:[#allocation2 + $0xc0] sm:$0xff]  ;;  %v313_v5 = vld [vmem:[#allocation2 + $0xe8] sm:$0xff] }
  0x34   :  { %1236 = vset.pattern.permute.xlu0 %v1298_v1  ;;  %v315_v7 = vld [vmem:[#allocation2 + $0xf8] sm:$0xff]  ;;  %v312_v11 = vld [vmem:[#allocation2 + $0xe0] sm:$0xff]  ;;  %v314_v12 = vld [vmem:[#allocation2 + $0xf0] sm:$0xff] }
  0x35   :  { %99 = vperm.xlu0 %1236, %v63_v3   ;;  %1104 = vmatpush1.bf16.msra.mxu0 %v1103_v34  ;;  %v310_v3 = vld [vmem:[#allocation2 + $0xd0] sm:$0xff]  ;;  %v1121_v10 = vpack.c.bf16 %v315_v7, %v313_v5  ;;  %v1123_v14 = vpack.c.bf16 %v314_v12, %v312_v11  ;;  %v76_v15 = vld [vmem:[%s1723_s1 + $0x28] sm:$0xff]  ;;  %v70_v16 = vld [vmem:[%s1722_s0 + $0x38] sm:$0xff] }
  0x36   :  { %203 = vperm.xlu1 %1233, %v88_v25   ;;  %1106 = vmatprep.subr.bf16.mxu0 %v1105_v35  ;;  %v1119_v9 = vpack.c.bf16 %v310_v3, %v308_v2  ;;  %v84_v17 = vcvt.s32.f32 %v76_v15  ;;  %v78_v18 = vld [vmem:[%s1723_s1 + $0x38] sm:$0xff]  ;;  %v458_v21 = vld [vmem:[#allocation4 + $0x8] sm:$0xff]  ;;  %v461_v22 = vld [vmem:[#allocation4 + $0x20] sm:$0xff] }
  0x37   :  { %v86_v19 = vcvt.s32.f32 %v78_v18  ;;  %v457_v23 = vld [vmem:[#allocation4] sm:$0xff]  ;;  %v1125_v24 = vpack.c.bf16 %v461_v22, %v458_v21  ;;  %v460_v25 = vld [vmem:[#allocation4 + $0x18] sm:$0xff]  ;;  %v467_v27 = vld [vmem:[#allocation4 + $0x50] sm:$0xff] }
  0x38   :  { %v464_v26 = vld [vmem:[#allocation4 + $0x38] sm:$0xff]  ;;  %v1127_v28 = vpack.c.bf16 %v460_v25, %v457_v23  ;;  %v463_v30 = vld [vmem:[#allocation4 + $0x30] sm:$0xff]  ;;  %v466_v31 = vld [vmem:[#allocation4 + $0x48] sm:$0xff] }
  0x39   :  { %208 = vperm.xlu0 %1236, %v89_v32   ;;  %1108 = vmatpush1.bf16.msra.mxu0 %v1107_v42  ;;  %v95_v20 = vmul.f32 0.001, %v86_v19  ;;  %v1129_v29 = vpack.c.bf16 %v467_v27, %v464_v26  ;;  %v470_v32 = vld [vmem:[#allocation4 + $0x68] sm:$0xff]  ;;  %v1131_v33 = vpack.c.bf16 %v466_v31, %v463_v30  ;;  %v469_v34 = vld [vmem:[#allocation4 + $0x60] sm:$0xff]  ;;  %v472_v35 = vld [vmem:[#allocation4 + $0x78] sm:$0xff] }
  0x3a   :  { %1234 = vset.pattern.permute.xlu1 %v1297_v0  ;;  %1110 = vmatprep.subr.bf16.mxu0 %v1109_v43  ;;  %v476_v36 = vld [vmem:[#allocation4 + $0x98] sm:$0xff]  ;;  %v479_v37 = vld [vmem:[#allocation4 + $0xb0] sm:$0xff]  ;;  %v1135_v38 = vpack.c.bf16 %v472_v35, %v469_v34  ;;  %v478_v41 = vld [vmem:[#allocation4 + $0xa8] sm:$0xff] }
  0x3b   :  { %158 = vperm.xlu1 %1234, %v65_v8   ;;  %v94_v8 = vmul.f32 0.001, %v85_v59  ;;  %1126 = vmatprep.subr.bf16.mxu1 %v1125_v24  ;;  %v1137_v39 = vpack.c.bf16 %v479_v37, %v476_v36  ;;  %v482_v42 = vld [vmem:[#allocation4 + $0xc8] sm:$0xff]  ;;  %v485_v43 = vld [vmem:[#allocation4 + $0xe0] sm:$0xff]  ;;  %v507_v44 = vld [vmem:[#allocation4 + $0x190] sm:$0xff] }
  0x3c   :  { %1128 = vmatpush1.bf16.msra.mxu1 %v1127_v28  ;;  %v510_v45 = vld [vmem:[#allocation4 + $0x1a8] sm:$0xff]  ;;  %v1141_v48 = vpack.c.bf16 %v485_v43, %v482_v42  ;;  %v488_v51 = vld [vmem:[#allocation4 + $0xf8] sm:$0xff]  ;;  %v487_v56 = vld [vmem:[#allocation4 + $0xf0] sm:$0xff] }
  0x3d   :  { %213 = vperm.xlu0 %1236, %v90_v40   ;;  %1112 = vmatpush1.bf16.msra.mxu0 %v1111_v50  ;;  %v475_v40 = vld [vmem:[#allocation4 + $0x90] sm:$0xff]  ;;  %v1189_v47 = vpack.c.bf16 %v510_v45, %v507_v44  ;;  %v484_v50 = vld [vmem:[#allocation4 + $0xd8] sm:$0xff]  ;;  %v490_v57 = vld [vmem:[#allocation4 + $0x108] sm:$0xff] }
  0x3e   :  { %1114 = vmatprep.subr.bf16.mxu0 %v1113_v52  ;;  %1130 = vmatprep.subr.bf16.mxu1 %v1129_v29  ;;  %v1139_v46 = vpack.c.bf16 %v478_v41, %v475_v40  ;;  %v491_v52 = vld [vmem:[#allocation4 + $0x110] sm:$0xff]  ;;  %v497_v59 = vld [vmem:[#allocation4 + $0x140] sm:$0xff]  ;;  %v500_v2 = vld [vmem:[#allocation4 + $0x158] sm:$0xff] }
  0x3f   :  { %1235 = vset.pattern.permute.xlu1 %v1298_v1  ;;  %v1145_v54 = vpack.c.bf16 %v491_v52, %v488_v51  ;;  %v503_v3 = vld [vmem:[#allocation4 + $0x170] sm:$0xff]  ;;  %v512_v15 = vld [vmem:[#allocation4 + $0x1b8] sm:$0xff]  ;;  %v514_v19 = vld [vmem:[#allocation4 + $0x1c8] sm:$0xff] }
  0x40   :  { %114 = vperm.xlu1 %1235, %v1390_v4   ;;  %v83_v4 = vcvt.s32.f32 %v75_v60  ;;  %1132 = vmatpush1.bf16.msra.mxu1 %v1131_v33  ;;  %v1147_v60 = vpack.c.bf16 %v490_v57, %v487_v56  ;;  %v1153_v7 = vpack.c.bf16 %v503_v3, %v500_v2  ;;  %v511_v18 = vld [vmem:[#allocation4 + $0x1b0] sm:$0xff]  ;;  %v521_v21 = vld [vmem:[#allocation4 + $0x200] sm:$0xff]  ;;  %v520_v25 = vld [vmem:[#allocation4 + $0x1f8] sm:$0xff] }
  0x41   :  { %124 = vperm.xlu0 %1236, %v68_v49   ;;  %1116 = vmatpush1.bf16.msra.mxu0 %v1115_v61  ;;  %v1163_v22 = vpack.c.bf16 %v514_v19, %v511_v18  ;;  %v517_v24 = vld [vmem:[#allocation4 + $0x1e0] sm:$0xff]  ;;  %v524_v26 = vld [vmem:[#allocation4 + $0x218] sm:$0xff]  ;;  %v527_v27 = vld [vmem:[#allocation4 + $0x230] sm:$0xff] }
  0x42   :  { %1118 = vmatprep.subr.bf16.mxu0 %v1117_v63  ;;  %v92_v13 = vmul.f32 0.001, %v83_v4  ;;  %v496_v63 = vld [vmem:[#allocation4 + $0x138] sm:$0xff]  ;;  %v499_v4 = vld [vmem:[#allocation4 + $0x150] sm:$0xff]  ;;  %v1167_v28 = vpack.c.bf16 %v520_v25, %v517_v24  ;;  %v1169_v29 = vpack.c.bf16 %v527_v27, %v524_v26  ;;  %v526_v31 = vld [vmem:[#allocation4 + $0x228] sm:$0xff] }
  0x43   :  { %v523_v30 = vld [vmem:[#allocation4 + $0x210] sm:$0xff]  ;;  %v529_v34 = vld [vmem:[#allocation4 + $0x240] sm:$0xff]  ;;  %v532_v35 = vld [vmem:[#allocation4 + $0x258] sm:$0xff] }
  0x44   :  { %218 = vperm.xlu1 %1235, %v91_v58   ;;  %v494_v58 = vld [vmem:[#allocation4 + $0x128] sm:$0xff]  ;;  %v1171_v33 = vpack.c.bf16 %v526_v31, %v523_v30  ;;  %v536_v36 = vld [vmem:[#allocation4 + $0x278] sm:$0xff]  ;;  %v539_v37 = vld [vmem:[#allocation4 + $0x290] sm:$0xff] }
  0x45   :  { %129 = vperm.xlu0 %1236, %v69_v62   ;;  %1120 = vmatpush1.bf16.msra.mxu0 %v1119_v9  ;;  %v1149_v61 = vpack.c.bf16 %v497_v59, %v494_v58  ;;  %v506_v9 = vld [vmem:[#allocation4 + $0x188] sm:$0xff]  ;;  %v535_v40 = vld [vmem:[#allocation4 + $0x270] sm:$0xff]  ;;  %v545_v43 = vld [vmem:[#allocation4 + $0x2c0] sm:$0xff] }
  0x46   :  { %1122 = vmatprep.subr.bf16.mxu0 %v1121_v10  ;;  %v509_v10 = vld [vmem:[#allocation4 + $0x1a0] sm:$0xff]  ;;  %v538_v41 = vld [vmem:[#allocation4 + $0x288] sm:$0xff]  ;;  %v468_v30 = vld [vmem:[#allocation4 + $0x58] sm:$0xff] }
  0x47   :  { %v1157_v12 = vpack.c.bf16 %v509_v10, %v506_v9  ;;  %v542_v42 = vld [vmem:[#allocation4 + $0x2a8] sm:$0xff]  ;;  %v1179_v44 = vpack.c.bf16 %v538_v41, %v535_v40  ;;  %v96_v57 = vld [vmem:[%s1724_s2] sm:$0x7]  ;;  %v519_v31 = vld [vmem:[#allocation4 + $0x1f0] sm:$0xff] }
  0x48   :  { %119 = vperm.xlu1 %1235, %v1400_v6   ;;  %v93_v6 = vmul.f32 0.001, %v84_v17  ;;  %v1181_v45 = vpack.c.bf16 %v545_v43, %v542_v42  ;;  %v1482_v10 = vld [vmem:[%s1725_s3] ss:$0 sm:$0xff]  ;;  %v528_v42 = vld [vmem:[#allocation4 + $0x238] sm:$0xff] }
  0x49   :  { %233 = vperm.xlu0 %1236, %v94_v8   ;;  %1124 = vmatpush1.bf16.msra.mxu0 %v1123_v14  ;;  %v502_v8 = vld [vmem:[#allocation4 + $0x168] sm:$0xff]  ;;  %v508_v14 = vld [vmem:[#allocation4 + $0x198] sm:$0xff]  ;;  %v525_v41 = vld [vmem:[#allocation4 + $0x220] sm:$0xff] }
  0x4a   :  { %1190 = vmatprep.subr.bf16.mxu0 %v1189_v47  ;;  %v1155_v11 = vpack.c.bf16 %v502_v8, %v499_v4 }
  0x4c   :  { %223 = vperm.xlu1 %1235, %v92_v13   ;;  %v505_v13 = vld [vmem:[#allocation4 + $0x180] sm:$0xff] }
  0x4d   :  { %1241 = vset.pattern.permute.xlu0 %v1297_v0  ;;  %v1159_v17 = vpack.c.bf16 %v508_v14, %v505_v13 }
  0x4e   :  { %178 = vperm.xlu0 %1241, %v70_v16  }
  0x50   :  { %1237 = vset.pattern.permute.xlu1 %v1297_v0 }
  0x51   :  { %170 = vperm.xlu1 %1237, %v68_v49   ;;  %v481_v49 = vld [vmem:[#allocation4 + $0xc0] sm:$0xff] }
  0x52   :  { %1242 = vset.pattern.permute.xlu0 %v1298_v1  ;;  %v1143_v53 = vpack.c.bf16 %v484_v50, %v481_v49 }
  0x55   :  { %1238 = vset.pattern.permute.xlu1 %v1298_v1 }
  0x56   :  { %228 = vperm.xlu1 %1238, %v93_v6  }
  0x5a   :  { %1239 = vset.pattern.permute.xlu1 %v1297_v0  ;;  %v473_v0 = vld [vmem:[#allocation4 + $0x80] sm:$0xff] }
  0x5b   :  { %174 = vperm.xlu1 %1239, %v69_v62   ;;  %v493_v62 = vld [vmem:[#allocation4 + $0x120] sm:$0xff] }
  0x5c   :  { %v1151_v5 = vpack.c.bf16 %v496_v63, %v493_v62 }
  0x5f   :  { %1240 = vset.pattern.permute.xlu1 %v1298_v1  ;;  %v1133_v1 = vpack.c.bf16 %v473_v0, %v470_v32  ;;  %v530_v32 = vld [vmem:[#allocation4 + $0x248] sm:$0xff]  ;;  %v533_v0 = vld [vmem:[#allocation4 + $0x260] sm:$0xff] }
  0x60   :  { %134 = vperm.xlu1 %1240, %v70_v16   ;;  %v515_v16 = vld [vmem:[#allocation4 + $0x1d0] sm:$0xff] }
  0x61   :  { %1134 = vmatprep.subr.bf16.mxu1 %v1133_v1  ;;  %v1161_v6 = vpack.c.bf16 %v515_v16, %v512_v15  ;;  %v1173_v1 = vpack.c.bf16 %v533_v0, %v530_v32  ;;  %v462_v15 = vld [vmem:[#allocation4 + $0x28] sm:$0xff]  ;;  %v513_v16 = vld [vmem:[#allocation4 + $0x1c0] sm:$0xff] }
  0x62   :  { %1136 = vmatpush1.bf16.msra.mxu1 %v1135_v38  ;;  %v1175_v38 = vpack.c.bf16 %v532_v35, %v529_v34  ;;  %v522_v32 = vld [vmem:[#allocation4 + $0x208] sm:$0xff] }
  0x63   :  { %1138 = vmatprep.subr.bf16.mxu1 %v1137_v39  ;;  %v1177_v39 = vpack.c.bf16 %v539_v37, %v536_v36  ;;  %v1197_v37 = vpack.c.bf16 %v522_v32, %v519_v31 }
  0x64   :  { %238 = vperm.xlu1 %1240, %v95_v20   ;;  %v518_v20 = vld [vmem:[#allocation4 + $0x1e8] sm:$0xff] }
  0x65   :  { %v1165_v23 = vpack.c.bf16 %v521_v21, %v518_v20 }
  0x66   :  { %1140 = vmatpush1.bf16.msra.mxu1 %v1139_v46  ;;  %v137_v46 = vlaneseq }
  0x67   :  { %1142 = vmatprep.subr.bf16.mxu1 %v1141_v48 }
  0x68   :  { %v1449_v49 = vshrl.u32 %v137_v46, 7 }
  0x6a   :  { %1144 = vmatpush1.bf16.msra.mxu1 %v1143_v53  ;;  %v1452_v52 = vsub.s32 1, %v1449_v49  ;;  %v1455_v53 = vsub.s32 2, %v1449_v49 }
  0x6b   :  { %1146 = vmatprep.subr.bf16.mxu1 %v1145_v54  ;;  %v1458_v54 = vsub.s32 0, %v1449_v49 }
  0x6c   :  { %v1466_v58 = vrot.slane %v96_v57, %v1452_v52 }
  0x6e   :  { %1148 = vmatpush1.bf16.msra.mxu1 %v1147_v60  ;;  %v1469_v60 = vrot.slane %v96_v57, %v1455_v53 }
  0x6f   :  { %1150 = vmatprep.subr.bf16.mxu1 %v1149_v61  ;;  %v1472_v61 = vrot.slane %v96_v57, %v1458_v54  ;;  %v477_v57 = vld [vmem:[#allocation4 + $0xa0] sm:$0xff] }
  0x72   :  { %1152 = vmatpush1.bf16.msra.mxu1 %v1151_v5 }
  0x73   :  { %1154 = vmatprep.subr.bf16.mxu1 %v1153_v7 }
  0x76   :  { %1156 = vmatpush1.bf16.msra.mxu1 %v1155_v11  ;;  %v459_v11 = vld [vmem:[#allocation4 + $0x10] sm:$0xff] }
  0x77   :  { %1158 = vmatprep.subr.bf16.mxu1 %v1157_v12 }
  0x7a   :  { %1160 = vmatpush1.bf16.msra.mxu1 %v1159_v17  ;;  %v516_v17 = vld [vmem:[#allocation4 + $0x1d8] sm:$0xff] }
  0x7b   :  { %1162 = vmatprep.subr.bf16.mxu1 %v1161_v6  ;;  %v1193_v24 = vpack.c.bf16 %v516_v17, %v513_v16 }
  0x7e   :  { %1164 = vmatpush1.bf16.msra.mxu1 %v1163_v22 }
  0x7f   :  { %1166 = vmatprep.subr.bf16.mxu1 %v1165_v23  ;;  %v1191_v23 = vpack.c.bf16 %v462_v15, %v459_v11  ;;  %v486_v11 = vld [vmem:[#allocation4 + $0xe8] sm:$0xff] }
  0x82   :  { %1168 = vmatpush1.bf16.msra.mxu1 %v1167_v28 }
  0x83   :  { %1170 = vmatprep.subr.bf16.mxu1 %v1169_v29  ;;  %v465_v29 = vld [vmem:[#allocation4 + $0x40] sm:$0xff] }
  0x84   :  { %v1195_v34 = vpack.c.bf16 %v468_v30, %v465_v29 }
  0x86   :  { %1172 = vmatpush1.bf16.msra.mxu1 %v1171_v33 }
  0x87   :  { %1174 = vmatprep.subr.bf16.mxu1 %v1173_v1 }
  0x8a   :  { %1176 = vmatpush1.bf16.msra.mxu1 %v1175_v38  ;;  %v471_v38 = vld [vmem:[#allocation4 + $0x70] sm:$0xff] }
  0x8b   :  { %1178 = vmatprep.subr.bf16.mxu1 %v1177_v39  ;;  %v474_v39 = vld [vmem:[#allocation4 + $0x88] sm:$0xff] }
  0x8c   :  { %v1199_v46 = vpack.c.bf16 %v474_v39, %v471_v38 }
  0x8e   :  { %1180 = vmatpush1.bf16.msra.mxu1 %v1179_v44 }
  0x8f   :  { %1182 = vmatprep.subr.bf16.mxu1 %v1181_v45 }
  0xa7   :  { %v105_v47 = vpop.permute.xlu1 %104  ;;  %v151_v48 = vpop.permute.xlu0 %150 }
  0xa8   :  { %v185_v62 = vmul.f32 %v1466_v58, %v151_v48  ;;  %v142_v4 = vmul.f32 %v1472_v61, %v105_v47  ;;  %v1201_v48 = vpack.c.bf16 %v528_v42, %v525_v41 }
  0xab   :  { %v163_v50 = vpop.permute.xlu0 %162 }
  0xac   :  { %v155_v51 = vpop.permute.xlu1 %154  ;;  %v188_v40 = vmul.f32 %v1466_v58, %v163_v50  ;;  %v531_v50 = vld [vmem:[#allocation4 + $0x250] sm:$0xff] }
  0xad   :  { %v186_v2 = vmul.f32 %v1466_v58, %v155_v51 }
  0xaf   :  { %v1460_v56 = vpop.permute.xlu0 %166  ;;  %v194_v12 = vadd.f32 %v186_v2, %v142_v4 }
  0xb1   :  { %v110_v59 = vpop.permute.xlu1 %109 }
  0xb2   :  { %v143_v18 = vmul.f32 %v1472_v61, %v110_v59  ;;  %v480_v59 = vld [vmem:[#allocation4 + $0xb8] sm:$0xff] }
  0xb4   :  { %v100_v63 = vpop.permute.xlu0 %99 }
  0xb5   :  { %v141_v3 = vmul.f32 %v1472_v61, %v100_v63  ;;  %v204_v5 = vpop.permute.xlu1 %203  ;;  %v534_v63 = vld [vmem:[#allocation4 + $0x268] sm:$0xff] }
  0xb6   :  { %v245_v7 = vmul.f32 %v1469_v60, %v204_v5  ;;  %v1203_v5 = vpack.c.bf16 %v480_v59, %v477_v57 }
  0xb7   :  { %v193_v8 = vadd.f32 %v185_v62, %v141_v3 }
  0xb8   :  { %v209_v9 = vpop.permute.xlu0 %208 }
  0xb9   :  { %v253_v13 = vadd.f32 %v245_v7, %v193_v8  ;;  %v246_v14 = vmul.f32 %v1469_v60, %v209_v9  ;;  %v189_v7 = vmul.f32 %v1466_v58, %v1460_v56  ;;  %v1205_v8 = vpack.c.bf16 %v534_v63, %v531_v50  ;;  %v483_v9 = vld [vmem:[#allocation4 + $0xd0] sm:$0xff]  ;;  %v489_v56 = vld [vmem:[#allocation4 + $0x100] sm:$0xff] }
  0xba   :  { %v159_v6 = vpop.permute.xlu1 %158  ;;  %v541_v63 = vld [vmem:[#allocation4 + $0x2a0] sm:$0xff] }
  0xbb   :  { %v254_v19 = vadd.f32 %v246_v14, %v194_v12  ;;  %v187_v20 = vmul.f32 %v1466_v58, %v159_v6  ;;  %v268_v21 = vadd.f32 %v1482_v10, %v253_v13  ;;  %v537_v13 = vld [vmem:[#allocation4 + $0x280] sm:$0xff]  ;;  %v540_v14 = vld [vmem:[#allocation4 + $0x298] sm:$0xff]  ;;  %v1207_v6 = vpack.c.bf16 %v486_v11, %v483_v9  ;;  %v547_v11 = vld [vmem:[#allocation4 + $0x2d0] sm:$0xff] }
  0xbc   :  { %v214_v22 = vpop.permute.xlu0 %213  ;;  %v552_v9 = vld [vmem:[#allocation4 + $0x2f8] sm:$0xff] }
  0xbd   :  { %v195_v25 = vadd.f32 %v187_v20, %v143_v18  ;;  %v247_v26 = vmul.f32 %v1469_v60, %v214_v22  ;;  %v276_v27 = vmax.f32 %v268_v21, 0.0  ;;  %v269_v28 = vadd.f32 %v1482_v10, %v254_v19  ;;  %v492_v20 = vld [vmem:[#allocation4 + $0x118] sm:$0xff]  ;;  %v543_v21 = vld [vmem:[#allocation4 + $0x2b0] sm:$0xff]  ;;  %v546_v22 = vld [vmem:[#allocation4 + $0x2c8] sm:$0xff] }
  0xbe   :  { %v1209_v19 = vpack.c.bf16 %v540_v14, %v537_v13  ;;  %v504_v14 = vld [vmem:[#allocation4 + $0x178] sm:$0xff] }
  0xbf   :  { %v255_v0 = vadd.f32 %v247_v26, %v195_v25  ;;  %v115_v33 = vpop.permute.xlu1 %114  ;;  %393 = vmatmul.mubr.f32.vlgmr.msra.gmra.mrb[0].mxu0 %v276_v27  ;;  %v277_v35 = vmax.f32 %v269_v28, 0.0  ;;  %v1211_v25 = vpack.c.bf16 %v492_v20, %v489_v56  ;;  %v1213_v28 = vpack.c.bf16 %v546_v22, %v543_v21 }
  0xc0   :  { %v144_v1 = vmul.f32 %v1472_v61, %v115_v33  ;;  %398 = vmatprep.mubr.f32.mxu0 %v1299_v55  ;;  %1192 = vmatpush3.bf16.msra.mxu0 %v1191_v23  ;;  %v125_v17 = vpop.permute.xlu0 %124 }
  0xc1   :  { %v270_v36 = vadd.f32 %v1482_v10, %v255_v0  ;;  %1194 = vmatprep.subr.bf16.mxu0 %v1193_v24  ;;  %v146_v30 = vmul.f32 %v1472_v61, %v125_v17 }
  0xc2   :  { %v196_v44 = vadd.f32 %v188_v40, %v144_v1 }
  0xc3   :  { %v219_v43 = vpop.permute.xlu1 %218  ;;  %399 = vmatmul.mubr.f32.gmra.mrb[2].mxu0 %v277_v35  ;;  %v278_v47 = vmax.f32 %v270_v36, 0.0 }
  0xc4   :  { %v248_v45 = vmul.f32 %v1469_v60, %v219_v43  ;;  %404 = vmatprep.mubr.f32.mxu0 %v1299_v55  ;;  %1196 = vmatpush3.bf16.msra.mxu0 %v1195_v34  ;;  %v130_v29 = vpop.permute.xlu0 %129 }
  0xc5   :  { %1198 = vmatprep.subr.bf16.mxu0 %v1197_v37  ;;  %v147_v36 = vmul.f32 %v1472_v61, %v130_v29 }
  0xc6   :  { %v256_v51 = vadd.f32 %v248_v45, %v196_v44 }
  0xc7   :  { %v120_v62 = vpop.permute.xlu1 %119  ;;  %405 = vmatmul.mubr.f32.gmra.mrb[4].mxu0 %v278_v47 }
  0xc8   :  { %v145_v2 = vmul.f32 %v1472_v61, %v120_v62  ;;  %410 = vmatprep.mubr.f32.mxu0 %v1299_v55  ;;  %v271_v3 = vadd.f32 %v1482_v10, %v256_v51  ;;  %1200 = vmatpush3.bf16.msra.mxu0 %v1199_v46  ;;  %v234_v1 = vpop.permute.xlu0 %233 }
  0xc9   :  { %1202 = vmatprep.subr.bf16.mxu0 %v1201_v48  ;;  %v251_v39 = vmul.f32 %v1469_v60, %v234_v1 }
  0xca   :  { %v279_v4 = vmax.f32 %v271_v3, 0.0  ;;  %v197_v15 = vadd.f32 %v189_v7, %v145_v2  ;;  %v544_v2 = vld [vmem:[#allocation4 + $0x2b8] sm:$0xff] }
  0xcb   :  { %v224_v12 = vpop.permute.xlu1 %223  ;;  %v1183_v3 = vpack.c.bf16 %v544_v2, %v541_v63  ;;  %v548_v7 = vld [vmem:[#allocation4 + $0x2d8] sm:$0xff] }
  0xcc   :  { %v249_v16 = vmul.f32 %v1469_v60, %v224_v12  ;;  %411 = vmatmul.mubr.f32.gmra.mrb[6].mxu0 %v279_v4  ;;  %v551_v4 = vld [vmem:[#allocation4 + $0x2f0] sm:$0xff]  ;;  %v550_v12 = vld [vmem:[#allocation4 + $0x2e8] sm:$0xff] }
  0xcd   :  { %416 = vmatprep.mubr.f32.mxu0 %v1299_v55  ;;  %1204 = vmatpush3.bf16.msra.mxu0 %v1203_v5  ;;  %v179_v41 = vpop.permute.xlu0 %178  ;;  %v1187_v13 = vpack.c.bf16 %v550_v12, %v547_v11  ;;  %v903_v11 = vsub.s32 3, %v1449_v49  ;;  %v907_v12 = vsub.s32 5, %v1449_v49 }
  0xce   :  { %v257_v18 = vadd.f32 %v249_v16, %v197_v15  ;;  %1206 = vmatprep.subr.bf16.mxu0 %v1205_v8  ;;  %v192_v45 = vmul.f32 %v1466_v58, %v179_v41  ;;  %1184 = vmatpush1.bf16.msra.mxu1 %v1183_v3  ;;  %v549_v8 = vld [vmem:[#allocation4 + $0x2e0] sm:$0xff] }
  0xcf   :  { %v316_v16 = vld [vmem:[%s1727_s5] sm:$0x3] }
  0xd0   :  { %v171_v23 = vpop.permute.xlu1 %170  ;;  %v272_v24 = vadd.f32 %v1482_v10, %v257_v18  ;;  %v1523_v17 = vrot.slane %v316_v16, %v1458_v54 }
  0xd1   :  { %1208 = vmatpush3.bf16.msra.mxu0 %v1207_v6  ;;  %v190_v26 = vmul.f32 %v1466_v58, %v171_v23  ;;  %v1526_v6 = vrot.slane %v316_v16, %v1452_v52 }
  0xd2   :  { %v280_v27 = vmax.f32 %v272_v24, 0.0  ;;  %1210 = vmatprep.subr.bf16.mxu0 %v1209_v19 }
  0xd3   :  { %v198_v32 = vadd.f32 %v190_v26, %v146_v30 }
  0xd4   :  { %417 = vmatmul.mubr.f32.gmra.mrb[8].mxu0 %v280_v27 }
  0xd5   :  { %v229_v31 = vpop.permute.xlu1 %228  ;;  %422 = vmatprep.mubr.f32.mxu0 %v1299_v55  ;;  %1212 = vmatpush3.bf16.msra.mxu0 %v1211_v25 }
  0xd6   :  { %v250_v0 = vmul.f32 %v1469_v60, %v229_v31  ;;  %1214 = vmatprep.subr.bf16.mxu0 %v1213_v28 }
  0xd8   :  { %v258_v33 = vadd.f32 %v250_v0, %v198_v32 }
  0xda   :  { %v175_v34 = vpop.permute.xlu1 %174  ;;  %v273_v35 = vadd.f32 %v1482_v10, %v258_v33 }
  0xdb   :  { %v191_v37 = vmul.f32 %v1466_v58, %v175_v34  ;;  %v498_v58 = vld [vmem:[#allocation4 + $0x148] sm:$0xff] }
  0xdc   :  { %v281_v38 = vmax.f32 %v273_v35, 0.0 }
  0xdd   :  { %v199_v40 = vadd.f32 %v191_v37, %v147_v36 }
  0xde   :  { %423 = vmatmul.mubr.f32.gmra.mrb[10].mxu0 %v281_v38 }
  0xdf   :  { %v259_v42 = vadd.f32 %v251_v39, %v199_v40  ;;  %v135_v43 = vpop.permute.xlu1 %134  ;;  %428 = vmatprep.mubr.f32.mxu0 %v1299_v55 }
  0xe0   :  { %v148_v44 = vmul.f32 %v1472_v61, %v135_v43  ;;  %v495_v61 = vld [vmem:[#allocation4 + $0x130] sm:$0xff] }
  0xe1   :  { %v274_v46 = vadd.f32 %v1482_v10, %v259_v42  ;;  %v1215_v5 = vpack.c.bf16 %v498_v58, %v495_v61 }
  0xe2   :  { %v200_v51 = vadd.f32 %v192_v45, %v148_v44 }
  0xe3   :  { %v239_v47 = vpop.permute.xlu1 %238  ;;  %v282_v48 = vmax.f32 %v274_v46, 0.0  ;;  %1216 = vmatpush3.bf16.msra.mxu0 %v1215_v5 }
  0xe4   :  { %v252_v57 = vmul.f32 %v1469_v60, %v239_v47  ;;  %v1185_v60 = vpack.c.bf16 %v551_v4, %v548_v7 }
  0xe5   :  { %429 = vmatmul.mubr.f32.gmra.mrb[12].mxu0 %v282_v48 }
  0xe6   :  { %v260_v59 = vadd.f32 %v252_v57, %v200_v51  ;;  %434 = vmatprep.mubr.f32.mxu0 %v1299_v55  ;;  %v1217_v55 = vpack.c.bf16 %v552_v9, %v549_v8  ;;  %1186 = vmatprep.subr.bf16.mxu1 %v1185_v60  ;;  %v553_v60 = vld [vmem:[%s1729_s7] sm:$0x7] }
  0xe7   :  { %1188 = vmatpush1.bf16.msra.mxu1 %v1187_v13  ;;  %v812_v9 = vld [vmem:[%s1730_s8] sm:$0x3f]  ;;  %v1554_v13 = vrot.slane %v553_v60, %v1458_v54 }
  0xe8   :  { %v275_v62 = vadd.f32 %v1482_v10, %v260_v59  ;;  %v501_v10 = vld [vmem:[#allocation4 + $0x160] sm:$0xff]  ;;  %1218 = vmatprep.subr.bf16.mxu0 %v1217_v55  ;;  %v824_v55 = vsub.s32 4, %v1449_v49  ;;  %v817_v16 = vrot.slane %v812_v9, %v1458_v54 }
  0xe9   :  { %v1219_v15 = vpack.c.bf16 %v504_v14, %v501_v10  ;;  %v900_v10 = vrot.slane %v812_v9, %v1452_v52  ;;  %v1558_v14 = vrot.slane %v553_v60, %v1452_v52 }
  0xea   :  { %v283_v50 = vmax.f32 %v275_v62, 0.0  ;;  %v825_v49 = vrot.slane %v812_v9, %v824_v55 }
  0xeb   :  { %1220 = vmatpush3.bf16.msra.mxu0 %v1219_v15  ;;  %v904_v15 = vrot.slane %v812_v9, %v903_v11 }
  0xec   :  { %435 = vmatmul.mubr.f32.gmra.mrb[14].mxu0 %v283_v50 }
 0x192   :  { %v394_v18 = vpop.f32.mrb[0].mxu0 }
 0x193   :  { %v395_v19 = vadd.f32 %v394_v18, %v1523_v17  ;;  %v396_v56 = vpop.f32.mrb[1].mxu0 }
 0x194   :  { %v397_v20 = vadd.f32 %v396_v56, %v1526_v6  ;;  %v908_v56 = vrot.slane %v812_v9, %v907_v12 }
 0x195   :  { %v441_v23 = vmax.f32 %v395_v19, 0.0  ;;  %v1563_v19 = vrot.slane %v553_v60, %v1455_v53 }
 0x196   :  { %v442_v21 = vmax.f32 %v397_v20, 0.0  ;;  %v400_v22 = vpop.f32.mrb[2].mxu0 }
 0x197   :  { %v401_v24 = vadd.f32 %v400_v22, %v1523_v17  ;;  %v402_v25 = vpop.f32.mrb[3].mxu0 }
 0x198   :  { %v403_v26 = vadd.f32 %v402_v25, %v1526_v6  ;;  %634 = vmatprep.mubr.f32.mxu1 %v442_v21  ;;  %747 = vmatprep.mubr.f32.mxu0 %v442_v21  ;;  %v1567_v21 = vrot.slane %v900_v10, %v1452_v52  ;;  %v1571_v25 = vrot.slane %v904_v15, %v1452_v52 }
 0x199   :  { %635 = vmatmul.mubr.f32.vlgmr.msra.gmra.mrb[0].mxu1 %v441_v23  ;;  %748 = vmatmul.mubr.f32.vlgmr.msra.gmra.mrb[16].mxu0 %v441_v23  ;;  %v443_v29 = vmax.f32 %v401_v24, 0.0 }
 0x19a   :  { %v444_v27 = vmax.f32 %v403_v26, 0.0  ;;  %v406_v28 = vpop.f32.mrb[4].mxu0 }
 0x19b   :  { %v407_v30 = vadd.f32 %v406_v28, %v1523_v17  ;;  %v408_v31 = vpop.f32.mrb[5].mxu0  ;;  %v1574_v28 = vrot.slane %v817_v16, %v1458_v54 }
 0x19c   :  { %v409_v32 = vadd.f32 %v408_v31, %v1526_v6  ;;  %640 = vmatprep.mubr.f32.mxu1 %v444_v27  ;;  %752 = vmatprep.mubr.f32.mxu0 %v444_v27 }
 0x19d   :  { %641 = vmatmul.mubr.f32.gmra.mrb[2].mxu1 %v443_v29  ;;  %753 = vmatmul.mubr.f32.gmra.mrb[18].mxu0 %v443_v29  ;;  %v445_v33 = vmax.f32 %v407_v30, 0.0 }
 0x19e   :  { %v446_v0 = vmax.f32 %v409_v32, 0.0 }
 0x19f   :  { %v412_v1 = vpop.f32.mrb[6].mxu0 }
 0x1a0   :  { %v413_v34 = vadd.f32 %v412_v1, %v1523_v17  ;;  %v414_v35 = vpop.f32.mrb[7].mxu0  ;;  %646 = vmatprep.mubr.f32.mxu1 %v446_v0  ;;  %757 = vmatprep.mubr.f32.mxu0 %v446_v0  ;;  %v1581_v0 = vrot.slane %v908_v56, %v1452_v52 }
 0x1a1   :  { %v415_v36 = vadd.f32 %v414_v35, %v1526_v6  ;;  %647 = vmatmul.mubr.f32.gmra.mrb[4].mxu1 %v445_v33  ;;  %758 = vmatmul.mubr.f32.gmra.mrb[20].mxu0 %v445_v33  ;;  %v1584_v33 = vrot.slane %v825_v49, %v1458_v54 }
 0x1a2   :  { %v447_v38 = vmax.f32 %v413_v34, 0.0 }
 0x1a3   :  { %v448_v37 = vmax.f32 %v415_v36, 0.0 }
 0x1a5   :  { %652 = vmatprep.mubr.f32.mxu1 %v448_v37  ;;  %762 = vmatprep.mubr.f32.mxu0 %v448_v37 }
 0x1a6   :  { %653 = vmatmul.mubr.f32.gmra.mrb[6].mxu1 %v447_v38  ;;  %763 = vmatmul.mubr.f32.gmra.mrb[22].mxu0 %v447_v38 }
 0x1a7   :  { %v418_v39 = vpop.f32.mrb[8].mxu0 }
 0x1a8   :  { %v419_v40 = vadd.f32 %v418_v39, %v1523_v17  ;;  %v420_v41 = vpop.f32.mrb[9].mxu0 }
 0x1a9   :  { %v421_v42 = vadd.f32 %v420_v41, %v1526_v6 }
 0x1aa   :  { %v449_v44 = vmax.f32 %v419_v40, 0.0 }
 0x1ab   :  { %v450_v43 = vmax.f32 %v421_v42, 0.0 }
 0x1ad   :  { %658 = vmatprep.mubr.f32.mxu1 %v450_v43  ;;  %767 = vmatprep.mubr.f32.mxu0 %v450_v43 }
 0x1ae   :  { %659 = vmatmul.mubr.f32.gmra.mrb[8].mxu1 %v449_v44  ;;  %768 = vmatmul.mubr.f32.gmra.mrb[24].mxu0 %v449_v44 }
 0x1b1   :  { %v424_v45 = vpop.f32.mrb[10].mxu0 }
 0x1b2   :  { %v425_v46 = vadd.f32 %v424_v45, %v1523_v17  ;;  %v426_v47 = vpop.f32.mrb[11].mxu0 }
 0x1b3   :  { %v427_v48 = vadd.f32 %v426_v47, %v1526_v6 }
 0x1b4   :  { %v451_v57 = vmax.f32 %v425_v46, 0.0 }
 0x1b5   :  { %v452_v51 = vmax.f32 %v427_v48, 0.0 }
 0x1b7   :  { %664 = vmatprep.mubr.f32.mxu1 %v452_v51  ;;  %772 = vmatprep.mubr.f32.mxu0 %v452_v51 }
 0x1b8   :  { %v430_v59 = vpop.f32.mrb[12].mxu0  ;;  %665 = vmatmul.mubr.f32.gmra.mrb[10].mxu1 %v451_v57  ;;  %773 = vmatmul.mubr.f32.gmra.mrb[26].mxu0 %v451_v57 }
 0x1b9   :  { %v431_v62 = vadd.f32 %v430_v59, %v1523_v17  ;;  %v432_v50 = vpop.f32.mrb[13].mxu0 }
 0x1ba   :  { %v433_v63 = vadd.f32 %v432_v50, %v1526_v6 }
 0x1bb   :  { %v453_v61 = vmax.f32 %v431_v62, 0.0 }
 0x1bc   :  { %v454_v2 = vmax.f32 %v433_v63, 0.0 }
 0x1be   :  { %670 = vmatprep.mubr.f32.mxu1 %v454_v2  ;;  %777 = vmatprep.mubr.f32.mxu0 %v454_v2 }
 0x1bf   :  { %v436_v3 = vpop.f32.mrb[14].mxu0  ;;  %671 = vmatmul.mubr.f32.gmra.mrb[12].mxu1 %v453_v61  ;;  %778 = vmatmul.mubr.f32.gmra.mrb[28].mxu0 %v453_v61 }
 0x1c0   :  { %v437_v58 = vadd.f32 %v436_v3, %v1523_v17  ;;  %v438_v5 = vpop.f32.mrb[15].mxu0  ;;  %v821_v17 = vrot.slane %v812_v9, %v1455_v53 }
 0x1c1   :  { %v439_v7 = vadd.f32 %v438_v5, %v1526_v6 }
 0x1c2   :  { %v455_v8 = vmax.f32 %v437_v58, 0.0  ;;  %v1577_v53 = vrot.slane %v821_v17, %v1458_v54 }
 0x1c3   :  { %v456_v4 = vmax.f32 %v439_v7, 0.0 }
 0x1c5   :  { %676 = vmatprep.mubr.f32.mxu1 %v456_v4  ;;  %782 = vmatprep.mubr.f32.mxu0 %v456_v4 }
 0x1c6   :  { %677 = vmatmul.mubr.f32.gmra.mrb[14].mxu1 %v455_v8  ;;  %783 = vmatmul.mubr.f32.gmra.mrb[30].mxu0 %v455_v8 }
 0x26c   :  { %v636_v6 = vpop.f32.mrb[0].mxu1  ;;  %v1069_v18 = vpop.f32.mrb[16].mxu0 }
 0x26d   :  { %v637_v20 = vadd.f32 %v636_v6, %v1554_v13  ;;  %v638_v22 = vpop.f32.mrb[1].mxu1  ;;  %v1070_v23 = vpop.f32.mrb[17].mxu0 }
 0x26e   :  { %v639_v24 = vadd.f32 %v638_v22, %v1558_v14  ;;  %v1071_v26 = vadd.f32 %v1070_v23, %v1069_v18 }
 0x26f   :  { %v788_v27 = vmax.f32 %v637_v20, 0.0 }
 0x270   :  { %v789_v29 = vmax.f32 %v639_v24, 0.0  ;;  %v750_v30 = vadd.f32 %v1071_v26, %v1563_v19  ;;  %v642_v31 = vpop.f32.mrb[2].mxu1  ;;  %v1072_v32 = vpop.f32.mrb[18].mxu0 }
 0x271   :  { %v924_v1 = vmul.f32 %v1567_v21, %v788_v27  ;;  %v643_v34 = vadd.f32 %v642_v31, %v1554_v13  ;;  %v644_v35 = vpop.f32.mrb[3].mxu1  ;;  %v1073_v36 = vpop.f32.mrb[19].mxu0  ;;  %v841_v40 = vmul.f32 %v1574_v28, %v788_v27 }
 0x272   :  { %v925_v37 = vmul.f32 %v1571_v25, %v789_v29  ;;  %v790_v38 = vmax.f32 %v750_v30, 0.0  ;;  %v645_v39 = vadd.f32 %v644_v35, %v1558_v14  ;;  %v842_v41 = vmul.f32 %v1577_v53, %v789_v29 }
 0x273   :  { %v791_v52 = vmax.f32 %v643_v34, 0.0  ;;  %v1074_v42 = vadd.f32 %v1073_v36, %v1072_v32 }
 0x274   :  { %v792_v43 = vmax.f32 %v645_v39, 0.0  ;;  %v648_v54 = vpop.f32.mrb[4].mxu1  ;;  %v1075_v44 = vpop.f32.mrb[20].mxu0  ;;  %v926_v45 = vmul.f32 %v1581_v0, %v790_v38  ;;  %v948_v46 = vadd.f32 %v925_v37, %v924_v1  ;;  %v843_v47 = vmul.f32 %v1584_v33, %v790_v38 }
 0x275   :  { %v844_v48 = vmul.f32 %v1574_v28, %v791_v52  ;;  %v927_v51 = vmul.f32 %v1567_v21, %v791_v52  ;;  %v755_v57 = vadd.f32 %v1074_v42, %v1563_v19  ;;  %v649_v59 = vadd.f32 %v648_v54, %v1554_v13  ;;  %v650_v62 = vpop.f32.mrb[5].mxu1  ;;  %v1076_v50 = vpop.f32.mrb[21].mxu0 }
 0x276   :  { %v845_v63 = vmul.f32 %v1577_v53, %v792_v43  ;;  %v928_v2 = vmul.f32 %v1571_v25, %v792_v43  ;;  %v651_v61 = vadd.f32 %v650_v62, %v1558_v14  ;;  %v1077_v3 = vadd.f32 %v1076_v50, %v1075_v44 }
 0x277   :  { %v793_v58 = vmax.f32 %v755_v57, 0.0  ;;  %v794_v5 = vmax.f32 %v649_v59, 0.0  ;;  %v949_v7 = vadd.f32 %v948_v46, %v926_v45  ;;  %v865_v4 = vadd.f32 %v842_v41, %v841_v40 }
 0x278   :  { %v795_v8 = vmax.f32 %v651_v61, 0.0  ;;  %v760_v60 = vadd.f32 %v1077_v3, %v1563_v19  ;;  %v869_v9 = vadd.f32 %v845_v63, %v844_v48  ;;  %v952_v11 = vadd.f32 %v928_v2, %v927_v51 }
 0x279   :  { %v847_v12 = vmul.f32 %v1574_v28, %v794_v5  ;;  %v930_v55 = vmul.f32 %v1567_v21, %v794_v5  ;;  %950 = vadd.xlane.f32.xlu0 %v949_v7  ;;  %v866_v10 = vadd.f32 %v865_v4, %v843_v47  ;;  %v654_v15 = vpop.f32.mrb[6].mxu1  ;;  %v1078_v16 = vpop.f32.mrb[22].mxu0  ;;  %v846_v17 = vmul.f32 %v1584_v33, %v793_v58 }
 0x27a   :  { %v848_v6 = vmul.f32 %v1577_v53, %v795_v8  ;;  %v931_v18 = vmul.f32 %v1571_v25, %v795_v8  ;;  %v796_v56 = vmax.f32 %v760_v60, 0.0  ;;  %v655_v49 = vadd.f32 %v654_v15, %v1554_v13  ;;  %v656_v20 = vpop.f32.mrb[7].mxu1  ;;  %v1079_v22 = vpop.f32.mrb[23].mxu0 }
 0x27b   :  { %867 = vadd.xlane.f32.xlu1 %v866_v10  ;;  %v657_v23 = vadd.f32 %v656_v20, %v1558_v14  ;;  %v1080_v24 = vadd.f32 %v1079_v22, %v1078_v16  ;;  %v870_v26 = vadd.f32 %v869_v9, %v846_v17  ;;  %v929_v27 = vmul.f32 %v1581_v0, %v793_v58 }
 0x27c   :  { %v797_v29 = vmax.f32 %v655_v49, 0.0  ;;  %v849_v30 = vmul.f32 %v1584_v33, %v796_v56  ;;  %v873_v31 = vadd.f32 %v848_v6, %v847_v12  ;;  %v932_v32 = vmul.f32 %v1581_v0, %v796_v56 }
 0x27d   :  { %v798_v1 = vmax.f32 %v657_v23, 0.0  ;;  %v765_v34 = vadd.f32 %v1080_v24, %v1563_v19  ;;  %871 = vadd.xlane.f32.xlu0 %v870_v26  ;;  %v953_v35 = vadd.f32 %v952_v11, %v929_v27  ;;  %v956_v36 = vadd.f32 %v931_v18, %v930_v55 }
 0x27e   :  { %v850_v37 = vmul.f32 %v1574_v28, %v797_v29  ;;  %v933_v38 = vmul.f32 %v1567_v21, %v797_v29  ;;  %v874_v39 = vadd.f32 %v873_v31, %v849_v30 }
 0x27f   :  { %v851_v40 = vmul.f32 %v1577_v53, %v798_v1  ;;  %v934_v41 = vmul.f32 %v1571_v25, %v798_v1  ;;  %v799_v52 = vmax.f32 %v765_v34, 0.0  ;;  %954 = vadd.xlane.f32.xlu1 %v953_v35  ;;  %v957_v42 = vadd.f32 %v956_v36, %v932_v32 }
 0x281   :  { %875 = vadd.xlane.f32.xlu0 %v874_v39  ;;  %v660_v43 = vpop.f32.mrb[8].mxu1  ;;  %v1081_v54 = vpop.f32.mrb[24].mxu0  ;;  %v852_v44 = vmul.f32 %v1584_v33, %v799_v52  ;;  %v877_v45 = vadd.f32 %v851_v40, %v850_v37  ;;  %v935_v46 = vmul.f32 %v1581_v0, %v799_v52  ;;  %v960_v47 = vadd.f32 %v934_v41, %v933_v38 }
 0x282   :  { %v661_v48 = vadd.f32 %v660_v43, %v1554_v13  ;;  %v662_v51 = vpop.f32.mrb[9].mxu1  ;;  %v1082_v57 = vpop.f32.mrb[25].mxu0 }
 0x283   :  { %v663_v59 = vadd.f32 %v662_v51, %v1558_v14  ;;  %v1083_v62 = vadd.f32 %v1082_v57, %v1081_v54  ;;  %v878_v50 = vadd.f32 %v877_v45, %v852_v44  ;;  %v961_v63 = vadd.f32 %v960_v47, %v935_v46 }
 0x284   :  { %v800_v2 = vmax.f32 %v661_v48, 0.0 }
 0x285   :  { %v801_v61 = vmax.f32 %v663_v59, 0.0  ;;  %v770_v3 = vadd.f32 %v1083_v62, %v1563_v19  ;;  %958 = vadd.xlane.f32.xlu0 %v957_v42  ;;  %879 = vadd.xlane.f32.xlu1 %v878_v50 }
 0x286   :  { %v853_v58 = vmul.f32 %v1574_v28, %v800_v2  ;;  %v936_v5 = vmul.f32 %v1567_v21, %v800_v2 }
 0x287   :  { %v854_v7 = vmul.f32 %v1577_v53, %v801_v61  ;;  %v937_v4 = vmul.f32 %v1571_v25, %v801_v61  ;;  %v802_v8 = vmax.f32 %v770_v3, 0.0 }
 0x289   :  { %962 = vadd.xlane.f32.xlu1 %v961_v63  ;;  %v855_v60 = vmul.f32 %v1584_v33, %v802_v8  ;;  %v881_v9 = vadd.f32 %v854_v7, %v853_v58  ;;  %v938_v11 = vmul.f32 %v1581_v0, %v802_v8  ;;  %v964_v12 = vadd.f32 %v937_v4, %v936_v5 }
 0x28b   :  { %v666_v55 = vpop.f32.mrb[10].mxu1  ;;  %v1084_v10 = vpop.f32.mrb[26].mxu0  ;;  %v882_v15 = vadd.f32 %v881_v9, %v855_v60  ;;  %v965_v16 = vadd.f32 %v964_v12, %v938_v11 }
 0x28c   :  { %v667_v17 = vadd.f32 %v666_v55, %v1554_v13  ;;  %v668_v6 = vpop.f32.mrb[11].mxu1  ;;  %v1085_v18 = vpop.f32.mrb[27].mxu0 }
 0x28d   :  { %v669_v56 = vadd.f32 %v668_v6, %v1558_v14  ;;  %v1086_v49 = vadd.f32 %v1085_v18, %v1084_v10  ;;  %883 = vadd.xlane.f32.xlu0 %v882_v15 }
 0x28e   :  { %v803_v20 = vmax.f32 %v667_v17, 0.0 }
 0x28f   :  { %v804_v22 = vmax.f32 %v669_v56, 0.0  ;;  %v775_v23 = vadd.f32 %v1086_v49, %v1563_v19 }
 0x290   :  { %v856_v24 = vmul.f32 %v1574_v28, %v803_v20  ;;  %v939_v26 = vmul.f32 %v1567_v21, %v803_v20 }
 0x291   :  { %v857_v27 = vmul.f32 %v1577_v53, %v804_v22  ;;  %v940_v29 = vmul.f32 %v1571_v25, %v804_v22  ;;  %v805_v30 = vmax.f32 %v775_v23, 0.0  ;;  %966 = vadd.xlane.f32.xlu0 %v965_v16 }
 0x292   :  { %v672_v31 = vpop.f32.mrb[12].mxu1  ;;  %v1087_v32 = vpop.f32.mrb[28].mxu0 }
 0x293   :  { %v673_v1 = vadd.f32 %v672_v31, %v1554_v13  ;;  %v674_v34 = vpop.f32.mrb[13].mxu1  ;;  %v1088_v35 = vpop.f32.mrb[29].mxu0  ;;  %v858_v36 = vmul.f32 %v1584_v33, %v805_v30  ;;  %v885_v37 = vadd.f32 %v857_v27, %v856_v24  ;;  %v941_v38 = vmul.f32 %v1581_v0, %v805_v30 }
 0x294   :  { %v675_v39 = vadd.f32 %v674_v34, %v1558_v14  ;;  %v1089_v40 = vadd.f32 %v1088_v35, %v1087_v32  ;;  %v968_v41 = vadd.f32 %v940_v29, %v939_v26 }
 0x295   :  { %v806_v52 = vmax.f32 %v673_v1, 0.0  ;;  %v886_v42 = vadd.f32 %v885_v37, %v858_v36 }
 0x296   :  { %v807_v43 = vmax.f32 %v675_v39, 0.0  ;;  %v780_v54 = vadd.f32 %v1089_v40, %v1563_v19  ;;  %v969_v44 = vadd.f32 %v968_v41, %v941_v38 }
 0x297   :  { %v859_v45 = vmul.f32 %v1574_v28, %v806_v52  ;;  %v942_v46 = vmul.f32 %v1567_v21, %v806_v52  ;;  %887 = vadd.xlane.f32.xlu1 %v886_v42 }
 0x298   :  { %v860_v47 = vmul.f32 %v1577_v53, %v807_v43  ;;  %v943_v48 = vmul.f32 %v1571_v25, %v807_v43  ;;  %v808_v51 = vmax.f32 %v780_v54, 0.0 }
 0x299   :  { %v678_v57 = vpop.f32.mrb[14].mxu1  ;;  %v1090_v59 = vpop.f32.mrb[30].mxu0 }
 0x29a   :  { %v679_v62 = vadd.f32 %v678_v57, %v1554_v13  ;;  %v680_v50 = vpop.f32.mrb[15].mxu1  ;;  %v1091_v63 = vpop.f32.mrb[31].mxu0  ;;  %v861_v2 = vmul.f32 %v1584_v33, %v808_v51  ;;  %v889_v61 = vadd.f32 %v860_v47, %v859_v45  ;;  %v944_v3 = vmul.f32 %v1581_v0, %v808_v51 }
 0x29b   :  { %v681_v58 = vadd.f32 %v680_v50, %v1558_v14  ;;  %v1092_v5 = vadd.f32 %v1091_v63, %v1090_v59  ;;  %970 = vadd.xlane.f32.xlu1 %v969_v44  ;;  %v972_v7 = vadd.f32 %v943_v48, %v942_v46 }
 0x29c   :  { %v809_v4 = vmax.f32 %v679_v62, 0.0  ;;  %v890_v8 = vadd.f32 %v889_v61, %v861_v2 }
 0x29d   :  { %v810_v60 = vmax.f32 %v681_v58, 0.0  ;;  %v785_v9 = vadd.f32 %v1092_v5, %v1563_v19  ;;  %v973_v11 = vadd.f32 %v972_v7, %v944_v3 }
 0x29e   :  { %v862_v13 = vmul.f32 %v1574_v28, %v809_v4  ;;  %v945_v12 = vmul.f32 %v1567_v21, %v809_v4  ;;  %891 = vadd.xlane.f32.xlu0 %v890_v8  ;;  %v1036_v21 = vld [vmem:[%s1731_s9] ss:$0 sm:$0xff] }
 0x29f   :  { %v863_v55 = vmul.f32 %v1577_v53, %v810_v60  ;;  %v946_v10 = vmul.f32 %v1571_v25, %v810_v60  ;;  %v811_v15 = vmax.f32 %v785_v9, 0.0 }
 0x2a1   :  { %v864_v14 = vmul.f32 %v1584_v33, %v811_v15  ;;  %v893_v16 = vadd.f32 %v863_v55, %v862_v13  ;;  %v947_v17 = vmul.f32 %v1581_v0, %v811_v15  ;;  %v976_v6 = vadd.f32 %v946_v10, %v945_v12 }
 0x2a2   :  { %974 = vadd.xlane.f32.xlu0 %v973_v11 }
 0x2a3   :  { %v894_v18 = vadd.f32 %v893_v16, %v864_v14  ;;  %v977_v19 = vadd.f32 %v976_v6, %v947_v17 }
 0x2a5   :  { %895 = vadd.xlane.f32.xlu1 %v894_v18 }
 0x2a9   :  { %978 = vadd.xlane.f32.xlu1 %v977_v19 }
 0x306   :  { %v951_v28 = vpop.xlane.xlu0 %950 }
 0x307   :  { %v1011_v53 = vadd.f32 %v1036_v21, %v951_v28 }
 0x308   :  { %v868_v25 = vpop.xlane.xlu1 %867 }
 0x309   :  { %v987_v56 = vadd.f32 %v1036_v21, %v868_v25 }
 0x30a   :  { %v872_v33 = vpop.xlane.xlu0 %871 }
 0x30b   :  { %996 = vst.msk [vmem:[%s1732_s10] sm:$0xff] %vm995_vm0, %v987_v56  ;;  %v988_v0 = vadd.f32 %v1036_v21, %v872_v33 }
 0x30c   :  { %1020 = vst.msk [vmem:[%s1732_s10] sm:$0xff] %vm1019_vm1, %v1011_v53  ;;  %v955_v49 = vpop.xlane.xlu1 %954 }
 0x30d   :  { %997 = vst.msk [vmem:[%s1732_s10 + $0x8] sm:$0xff] %vm995_vm0, %v988_v0  ;;  %v1012_v20 = vadd.f32 %v1036_v21, %v955_v49 }
 0x30e   :  { %v876_v22 = vpop.xlane.xlu0 %875 }
 0x30f   :  { %1021 = vst.msk [vmem:[%s1732_s10 + $0x8] sm:$0xff] %vm1019_vm1, %v1012_v20  ;;  %v989_v23 = vadd.f32 %v1036_v21, %v876_v22 }
 0x311   :  { %998 = vst.msk [vmem:[%s1732_s10 + $0x10] sm:$0xff] %vm995_vm0, %v989_v23 }
 0x312   :  { %v959_v24 = vpop.xlane.xlu0 %958  ;;  %v880_v26 = vpop.xlane.xlu1 %879 }
 0x313   :  { %v1013_v27 = vadd.f32 %v1036_v21, %v959_v24  ;;  %v990_v29 = vadd.f32 %v1036_v21, %v880_v26 }
 0x315   :  { %1022 = vst.msk [vmem:[%s1732_s10 + $0x10] sm:$0xff] %vm1019_vm1, %v1013_v27 }
 0x316   :  { %999 = vst.msk [vmem:[%s1732_s10 + $0x18] sm:$0xff] %vm995_vm0, %v990_v29  ;;  %v963_v30 = vpop.xlane.xlu1 %962 }
 0x317   :  { %v1014_v31 = vadd.f32 %v1036_v21, %v963_v30 }
 0x319   :  { %1023 = vst.msk [vmem:[%s1732_s10 + $0x18] sm:$0xff] %vm1019_vm1, %v1014_v31 }
 0x31a   :  { %v884_v32 = vpop.xlane.xlu0 %883 }
 0x31b   :  { %v991_v1 = vadd.f32 %v1036_v21, %v884_v32 }
 0x31d   :  { %1000 = vst.msk [vmem:[%s1732_s10 + $0x20] sm:$0xff] %vm995_vm0, %v991_v1 }
 0x31e   :  { %v967_v34 = vpop.xlane.xlu0 %966 }
 0x31f   :  { %v1015_v35 = vadd.f32 %v1036_v21, %v967_v34 }
 0x321   :  { %1024 = vst.msk [vmem:[%s1732_s10 + $0x20] sm:$0xff] %vm1019_vm1, %v1015_v35 }
 0x324   :  { %v888_v36 = vpop.xlane.xlu1 %887 }
 0x325   :  { %v992_v37 = vadd.f32 %v1036_v21, %v888_v36 }
 0x327   :  { %1001 = vst.msk [vmem:[%s1732_s10 + $0x28] sm:$0xff] %vm995_vm0, %v992_v37 }
 0x328   :  { %v971_v38 = vpop.xlane.xlu1 %970 }
 0x329   :  { %v1016_v39 = vadd.f32 %v1036_v21, %v971_v38 }
 0x32b   :  { %1025 = vst.msk [vmem:[%s1732_s10 + $0x28] sm:$0xff] %vm1019_vm1, %v1016_v39  ;;  %v892_v40 = vpop.xlane.xlu0 %891 }
 0x32c   :  { %v993_v41 = vadd.f32 %v1036_v21, %v892_v40 }
 0x32e   :  { %1002 = vst.msk [vmem:[%s1732_s10 + $0x30] sm:$0xff] %vm995_vm0, %v993_v41 }
 0x32f   :  { %v975_v52 = vpop.xlane.xlu0 %974 }
 0x330   :  { %v1017_v42 = vadd.f32 %v1036_v21, %v975_v52 }
 0x332   :  { %1026 = vst.msk [vmem:[%s1732_s10 + $0x30] sm:$0xff] %vm1019_vm1, %v1017_v42  ;;  %v896_v43 = vpop.xlane.xlu1 %895 }
 0x333   :  { %v994_v54 = vadd.f32 %v1036_v21, %v896_v43 }
 0x335   :  { %1003 = vst.msk [vmem:[%s1732_s10 + $0x38] sm:$0xff] %vm995_vm0, %v994_v54 }
 0x336   :  { %v979_v44 = vpop.xlane.xlu1 %978 }
 0x337   :  { %v1018_v45 = vadd.f32 %v1036_v21, %v979_v44 }
 0x339   :  { %1027 = vst.msk [vmem:[%s1732_s10 + $0x38] sm:$0xff] %vm1019_vm1, %v1018_v45 }
 0x33a   :  { %1032 = vsyncpa [#allocation3], 1 }
 0x33b   :  { %1033 = vsyncpa [#allocation5], 1 }

</bundles_post_ra>
